<compile_context>
chip_gen: v7x
topology: tpu7x:2x2x1
jax: 0.10.0
libtpu: 0.0.40
codegen_flags: <defaults>
</compile_context>

<pallas_src>
import functools

import jax
import jax.numpy as jnp
from jax.experimental import pallas as pl
from jax.experimental.pallas import tpu as pltpu


# ----------------------------------------------------------------------------
# Fused Pallas kernel: all hidden layers + merged (mean | log_var) head
# ----------------------------------------------------------------------------
def _fused_encoder_kernel(num_layers, hidden_dim, *refs):
    """refs = (x, w0, b0, ..., w_{L-1}, b_{L-1}, w_head, b_head, mean, log_var)."""
    x_ref = refs[0]
    layer_refs = refs[1:1 + 2 * num_layers]
    wh_ref = refs[1 + 2 * num_layers]
    bh_ref = refs[2 + 2 * num_layers]
    mean_ref = refs[3 + 2 * num_layers]
    logvar_ref = refs[4 + 2 * num_layers]

    # Keep all elementwise math in f32 (safe on v5e, accurate everywhere).
    x = x_ref[...].astype(jnp.float32)

    # Hidden stack: Linear + SiLU, chained entirely in registers/VMEM.
    for i in range(num_layers):
        w = layer_refs[2 * i][...]
        b = layer_refs[2 * i + 1][...]
        y = jnp.dot(x, w, preferred_element_type=jnp.float32) + b
        # SiLU(y) = y * sigmoid(y); exp and the approx reciprocal both go to
        # the EUP slot, keeping the VALU free.
        x = y * pl.reciprocal(1.0 + jnp.exp(-y), approx=True)

    # Merged heads: one matmul against [W_mean | W_logvar] of shape (D, 2*H).
    y = jnp.dot(x, wh_ref[...], preferred_element_type=jnp.float32) + bh_ref[...]
    mean_ref[...] = y[:, :hidden_dim].astype(mean_ref.dtype)
    logvar_ref[...] = y[:, hidden_dim:].astype(logvar_ref.dtype)


# ----------------------------------------------------------------------------
# Wrapper around pallas_call
# ----------------------------------------------------------------------------
def variational_encoder_forward(x, fused_params):
    """Fused forward pass. fused_params comes from prepare_fused_params()."""
    layers = fused_params["layers"]      # list of (W (Din, Dout), b (1, Dout))
    wh, bh = fused_params["head"]        # (D_last, 2*H), (1, 2*H)

    B, Din = x.shape
    H = wh.shape[1] // 2
    num_layers = len(layers)

    # Tile the batch dim; at toy sizes this is a single full block.
    block_b = B if B <= 128 else 128
    grid = (pl.cdiv(B, block_b),)

    in_specs = [pl.BlockSpec((block_b, Din), lambda i: (i, 0))]
    inputs = [x]
    for w, b in layers:
        in_specs.append(pl.BlockSpec(w.shape, lambda i: (0, 0)))  # full weight
        in_specs.append(pl.BlockSpec(b.shape, lambda i: (0, 0)))  # full bias
        inputs.extend([w, b])
    in_specs.append(pl.BlockSpec(wh.shape, lambda i: (0, 0)))
    in_specs.append(pl.BlockSpec(bh.shape, lambda i: (0, 0)))
    inputs.extend([wh, bh])

    out_specs = (
        pl.BlockSpec((block_b, H), lambda i: (i, 0)),
        pl.BlockSpec((block_b, H), lambda i: (i, 0)),
    )
    out_shape = (
        jax.ShapeDtypeStruct((B, H), x.dtype),
        jax.ShapeDtypeStruct((B, H), x.dtype),
    )

    kernel = functools.partial(_fused_encoder_kernel, num_layers, H)
    return pl.pallas_call(
        kernel,
        grid=grid,
        in_specs=in_specs,
        out_specs=out_specs,
        out_shape=out_shape,
        compiler_params=pltpu.CompilerParams(
            dimension_semantics=("parallel",)  # lets v7x shard batch over 2 TCs
        ),
    )(*inputs)


# ----------------------------------------------------------------------------
# Parameters
# ----------------------------------------------------------------------------
def init_params(key, encoder_shape, hidden_dim, dtype=jnp.float32):
    """Mirrors PyTorch Linear's U(-1/sqrt(fan_in), +1/sqrt(fan_in)) init."""
    def _linear(k, fan_in, fan_out):
        kw, kb = jax.random.split(k)
        bound = 1.0 / jnp.sqrt(fan_in)
        w = jax.random.uniform(kw, (fan_in, fan_out), dtype, -bound, bound)
        b = jax.random.uniform(kb, (fan_out,), dtype, -bound, bound)
        return w, b

    keys = jax.random.split(key, len(encoder_shape) + 1)
    params = {"layers": []}
    for i in range(len(encoder_shape) - 1):
        params["layers"].append(_linear(keys[i], encoder_shape[i], encoder_shape[i + 1]))
    params["mean"] = _linear(keys[-2], encoder_shape[-1], hidden_dim)
    params["log_var"] = _linear(keys[-1], encoder_shape[-1], hidden_dim)
    return params


def prepare_fused_params(params):
    """One-time prep: reshape biases to (1, D) and merge the two heads.

    TODO(synk): for batch >= 16 on v6e/v7x, cast weights to bfloat16 here
    (keep f32 accumulation in the kernel) to halve weight DMA bytes.
    """
    layers = [(w, b.reshape(1, -1)) for (w, b) in params["layers"]]
    wm, bm = params["mean"]
    wv, bv = params["log_var"]
    wh = jnp.concatenate([wm, wv], axis=1)                     # (D, 2*H)
    bh = jnp.concatenate([bm, bv], axis=0).reshape(1, -1)      # (1, 2*H)
    return {"layers": layers, "head": (wh, bh)}


def _reference_forward(x, params):
    """Pure-JAX reference for correctness checking."""
    for w, b in params["layers"]:
        x = x @ w + b
        x = x * jax.nn.sigmoid(x)
    wm, bm = params["mean"]
    wv, bv = params["log_var"]
    return x @ wm + bm, x @ wv + bv


# ----------------------------------------------------------------------------
# Main
# ----------------------------------------------------------------------------
if __name__ == "__main__":
    encoder_shape = (32, 64, 128)   # encoder_shape param of the module
    hidden_dim = 16                 # latent dimension
    batch = 8

    key = jax.random.PRNGKey(0)
    k_params, k_x = jax.random.split(key)
    params = init_params(k_params, encoder_shape, hidden_dim)
    fused = prepare_fused_params(params)
    x = jax.random.normal(k_x, (batch, encoder_shape[0]), jnp.float32)

    fwd = jax.jit(variational_encoder_forward)
    mean, log_var = fwd(x, fused)
    jax.block_until_ready((mean, log_var))

    # Sanity check against pure-JAX reference. Tolerance is slightly looser
    # than exact f32 because sigmoid uses the EUP approximate reciprocal.
    ref_mean, ref_log_var = _reference_forward(x, params)
    assert mean.shape == (batch, hidden_dim)
    assert log_var.shape == (batch, hidden_dim)
    assert jnp.allclose(mean, ref_mean, atol=3e-3, rtol=3e-3)
    assert jnp.allclose(log_var, ref_log_var, atol=3e-3, rtol=3e-3)

    print("KERNEL_OK")
</pallas_src>

<mosaic_0001>
module attributes {stable_mosaic.version = 11 : i64} {
  func.func @_fused_encoder_kernel(%arg0: i32, %arg1: memref<8x32xf32, #tpu.memory_space<vmem>>, %arg2: memref<32x64xf32, #tpu.memory_space<vmem>>, %arg3: memref<1x64xf32, #tpu.memory_space<vmem>>, %arg4: memref<64x128xf32, #tpu.memory_space<vmem>>, %arg5: memref<1x128xf32, #tpu.memory_space<vmem>>, %arg6: memref<128x32xf32, #tpu.memory_space<vmem>>, %arg7: memref<1x32xf32, #tpu.memory_space<vmem>>, %arg8: memref<8x16xf32, #tpu.memory_space<vmem>>, %arg9: memref<8x16xf32, #tpu.memory_space<vmem>>) attributes {dimension_semantics = [#tpu.dimension_semantics<parallel>], iteration_bounds = array<i64: 1>, scalar_prefetch = 0 : i64, scratch_operands = 0 : i64, tpu.core_type = #tpu.core_type<tc>, window_params = [{transform_indices = @transform_0, window_bounds = array<i64: 8, 32>}, {pipeline_mode = #tpu.pipeline_mode<synchronous>, transform_indices = @transform_1, window_bounds = array<i64: 32, 64>}, {pipeline_mode = #tpu.pipeline_mode<synchronous>, transform_indices = @transform_2, window_bounds = array<i64: 1, 64>}, {pipeline_mode = #tpu.pipeline_mode<synchronous>, transform_indices = @transform_3, window_bounds = array<i64: 64, 128>}, {pipeline_mode = #tpu.pipeline_mode<synchronous>, transform_indices = @transform_4, window_bounds = array<i64: 1, 128>}, {pipeline_mode = #tpu.pipeline_mode<synchronous>, transform_indices = @transform_5, window_bounds = array<i64: 128, 32>}, {pipeline_mode = #tpu.pipeline_mode<synchronous>, transform_indices = @transform_6, window_bounds = array<i64: 1, 32>}, {transform_indices = @transform_7, window_bounds = array<i64: 8, 16>}, {transform_indices = @transform_8, window_bounds = array<i64: 8, 16>}]} {
    %c0 = arith.constant 0 : index
    %c0_0 = arith.constant 0 : index
    %0 = vector.load %arg1[%c0, %c0_0] : memref<8x32xf32, #tpu.memory_space<vmem>>, vector<8x32xf32>
    %c0_1 = arith.constant 0 : index
    %c0_2 = arith.constant 0 : index
    %1 = vector.load %arg2[%c0_1, %c0_2] : memref<32x64xf32, #tpu.memory_space<vmem>>, vector<32x64xf32>
    %c0_3 = arith.constant 0 : index
    %c0_4 = arith.constant 0 : index
    %2 = vector.load %arg3[%c0_3, %c0_4] : memref<1x64xf32, #tpu.memory_space<vmem>>, vector<1x64xf32>
    %cst = arith.constant dense<0.000000e+00> : vector<8x64xf32>
    %3 = tpu.matmul %0, %1, %cst {dimension_numbers = #tpu.dot_dimension_numbers<[1], [0], [0], [1], [0, 0, 1, 1], [], []>} : vector<8x32xf32>, vector<32x64xf32>, vector<8x64xf32> -> vector<8x64xf32>
    %4 = vector.broadcast %2 : vector<1x64xf32> to vector<8x64xf32>
    %5 = arith.addf %3, %4 : vector<8x64xf32>
    %cst_5 = arith.constant 0.000000e+00 : f32
    %6 = vector.broadcast %cst_5 : f32 to vector<8x64xf32>
    %7 = arith.subf %6, %5 : vector<8x64xf32>
    %8 = math.exp %7 : vector<8x64xf32>
    %cst_6 = arith.constant 1.000000e+00 : f32
    %9 = vector.broadcast %cst_6 : f32 to vector<8x64xf32>
    %10 = arith.addf %9, %8 : vector<8x64xf32>
    %11 = tpu.reciprocal %10 {approx = true} : vector<8x64xf32> -> vector<8x64xf32>
    %12 = arith.mulf %5, %11 : vector<8x64xf32>
    %c0_7 = arith.constant 0 : index
    %c0_8 = arith.constant 0 : index
    %13 = vector.load %arg4[%c0_7, %c0_8] : memref<64x128xf32, #tpu.memory_space<vmem>>, vector<64x128xf32>
    %c0_9 = arith.constant 0 : index
    %c0_10 = arith.constant 0 : index
    %14 = vector.load %arg5[%c0_9, %c0_10] : memref<1x128xf32, #tpu.memory_space<vmem>>, vector<1x128xf32>
    %cst_11 = arith.constant dense<0.000000e+00> : vector<8x128xf32>
    %15 = tpu.matmul %12, %13, %cst_11 {dimension_numbers = #tpu.dot_dimension_numbers<[1], [0], [0], [1], [0, 0, 1, 1], [], []>} : vector<8x64xf32>, vector<64x128xf32>, vector<8x128xf32> -> vector<8x128xf32>
    %16 = vector.broadcast %14 : vector<1x128xf32> to vector<8x128xf32>
    %17 = arith.addf %15, %16 : vector<8x128xf32>
    %cst_12 = arith.constant 0.000000e+00 : f32
    %18 = vector.broadcast %cst_12 : f32 to vector<8x128xf32>
    %19 = arith.subf %18, %17 : vector<8x128xf32>
    %20 = math.exp %19 : vector<8x128xf32>
    %cst_13 = arith.constant 1.000000e+00 : f32
    %21 = vector.broadcast %cst_13 : f32 to vector<8x128xf32>
    %22 = arith.addf %21, %20 : vector<8x128xf32>
    %23 = tpu.reciprocal %22 {approx = true} : vector<8x128xf32> -> vector<8x128xf32>
    %24 = arith.mulf %17, %23 : vector<8x128xf32>
    %c0_14 = arith.constant 0 : index
    %c0_15 = arith.constant 0 : index
    %25 = vector.load %arg6[%c0_14, %c0_15] : memref<128x32xf32, #tpu.memory_space<vmem>>, vector<128x32xf32>
    %cst_16 = arith.constant dense<0.000000e+00> : vector<8x32xf32>
    %26 = tpu.matmul %24, %25, %cst_16 {dimension_numbers = #tpu.dot_dimension_numbers<[1], [0], [0], [1], [0, 0, 1, 1], [], []>} : vector<8x128xf32>, vector<128x32xf32>, vector<8x32xf32> -> vector<8x32xf32>
    %c0_17 = arith.constant 0 : index
    %c0_18 = arith.constant 0 : index
    %27 = vector.load %arg7[%c0_17, %c0_18] : memref<1x32xf32, #tpu.memory_space<vmem>>, vector<1x32xf32>
    %28 = vector.broadcast %27 : vector<1x32xf32> to vector<8x32xf32>
    %29 = arith.addf %26, %28 : vector<8x32xf32>
    %30 = vector.extract_strided_slice %29 {offsets = [0, 0], sizes = [8, 16], strides = [1, 1]} : vector<8x32xf32> to vector<8x16xf32>
    %c0_19 = arith.constant 0 : index
    %c0_20 = arith.constant 0 : index
    %31 = vector.load %arg8[%c0_19, %c0_20] : memref<8x16xf32, #tpu.memory_space<vmem>>, vector<8x16xf32>
    tpu.vector_store %arg8[%c0_19, %c0_20], %30 {strides = array<i32>} : memref<8x16xf32, #tpu.memory_space<vmem>>, vector<8x16xf32>,
    %32 = vector.extract_strided_slice %29 {offsets = [0, 16], sizes = [8, 16], strides = [1, 1]} : vector<8x32xf32> to vector<8x16xf32>
    %c0_21 = arith.constant 0 : index
    %c0_22 = arith.constant 0 : index
    %33 = vector.load %arg9[%c0_21, %c0_22] : memref<8x16xf32, #tpu.memory_space<vmem>>, vector<8x16xf32>
    tpu.vector_store %arg9[%c0_21, %c0_22], %32 {strides = array<i32>} : memref<8x16xf32, #tpu.memory_space<vmem>>, vector<8x16xf32>,
    return
  }
  func.func @transform_0(%arg0: i32) -> (i32, i32) {
    %c0_i32 = arith.constant 0 : i32
    %c0_i32_0 = arith.constant 0 : i32
    return %arg0, %c0_i32 : i32, i32
  }
  func.func @transform_1(%arg0: i32) -> (i32, i32) {
    %c0_i32 = arith.constant 0 : i32
    %c0_i32_0 = arith.constant 0 : i32
    %c0_i32_1 = arith.constant 0 : i32
    return %c0_i32, %c0_i32_0 : i32, i32
  }
  func.func @transform_2(%arg0: i32) -> (i32, i32) {
    %c0_i32 = arith.constant 0 : i32
    %c0_i32_0 = arith.constant 0 : i32
    %c0_i32_1 = arith.constant 0 : i32
    return %c0_i32, %c0_i32_0 : i32, i32
  }
  func.func @transform_3(%arg0: i32) -> (i32, i32) {
    %c0_i32 = arith.constant 0 : i32
    %c0_i32_0 = arith.constant 0 : i32
    %c0_i32_1 = arith.constant 0 : i32
    return %c0_i32, %c0_i32_0 : i32, i32
  }
  func.func @transform_4(%arg0: i32) -> (i32, i32) {
    %c0_i32 = arith.constant 0 : i32
    %c0_i32_0 = arith.constant 0 : i32
    %c0_i32_1 = arith.constant 0 : i32
    return %c0_i32, %c0_i32_0 : i32, i32
  }
  func.func @transform_5(%arg0: i32) -> (i32, i32) {
    %c0_i32 = arith.constant 0 : i32
    %c0_i32_0 = arith.constant 0 : i32
    %c0_i32_1 = arith.constant 0 : i32
    return %c0_i32, %c0_i32_0 : i32, i32
  }
  func.func @transform_6(%arg0: i32) -> (i32, i32) {
    %c0_i32 = arith.constant 0 : i32
    %c0_i32_0 = arith.constant 0 : i32
    %c0_i32_1 = arith.constant 0 : i32
    return %c0_i32, %c0_i32_0 : i32, i32
  }
  func.func @transform_7(%arg0: i32) -> (i32, i32) {
    %c0_i32 = arith.constant 0 : i32
    %c0_i32_0 = arith.constant 0 : i32
    return %arg0, %c0_i32 : i32, i32
  }
  func.func @transform_8(%arg0: i32) -> (i32, i32) {
    %c0_i32 = arith.constant 0 : i32
    %c0_i32_0 = arith.constant 0 : i32
    return %arg0, %c0_i32 : i32, i32
  }
}

</mosaic_0001>

<bundles_post_ra>
// kernel: variational_encoder_forward.1
= control target key start
LH: loop header
LB: loop body
LE: loop exit
PB: predicated region body
PF: predicated region fallthrough
CT: control target
= control target key end

     0   :  { %14 = vsyncpa [#allocation3], 0  ;;  %v550_v3 = vmov 0.0|0.0   ;;  %vm551_vm0 = vmmov 0   ;;  %v552_v6 = vmov 0.0   ;;  %s737_s0 = inlined_call_operand.vmem [shape: f32[8,32], index: 0, kind: input, shape index: {}]   ;;  %s738_s1 = inlined_call_operand.vmem [shape: f32[32,64], index: 1, kind: input, shape index: {}]   ;;  %s739_s2 = inlined_call_operand.vmem [shape: f32[1,64], index: 2, kind: input, shape index: {}]   ;;  %s740_s3 = inlined_call_operand.vmem [shape: f32[64,128], index: 3, kind: input, shape index: {}]   ;;  %s741_s4 = inlined_call_operand.vmem [shape: f32[1,128], index: 4, kind: input, shape index: {}]   ;;  %s742_s5 = inlined_call_operand.vmem [shape: f32[128,32], index: 5, kind: input, shape index: {}]   ;;  %s743_s6 = inlined_call_operand.vmem [shape: f32[1,32], index: 6, kind: input, shape index: {}]   ;;  %s744_s7 = inlined_call_operand.hbm [shape: f32[8,16], index: 7, kind: output, shape index: {0}]   ;;  %s745_s8 = inlined_call_operand.hbm [shape: f32[8,16], index: 8, kind: output, shape index: {1}]  }
   0x1   :  { %v31_v0 = vld [vmem:[%s738_s1] sm:$0xff]  ;;  %v32_v1 = vld [vmem:[%s738_s1 + $0x8] sm:$0xff]  ;;  %v33_v2 = vld [vmem:[%s738_s1 + $0x10] sm:$0xff]  ;;  %446 = vmatprep.subr.bf16.mxu1 %v550_v3  ;;  %389 = vmatprep.mubr.msk.f32.mxu1 %vm551_vm0, %v552_v6 }
   0x2   :  { %v447_v4 = vpack.c.bf16 %v32_v1, %v31_v0  ;;  %v34_v5 = vld [vmem:[%s738_s1 + $0x18] sm:$0xff]  ;;  %464 = vmatprep.subr.bf16.mxu0 %v550_v3  ;;  %443 = vmatprep.mubr.msk.f32.mxu0 %vm551_vm0, %v552_v6 }
   0x3   :  { %15 = vsyncpa [#allocation5], 0  ;;  %v450_v7 = vpack.c.bf16 %v34_v5, %v33_v2  ;;  %v30_v8 = vld [vmem:[%s737_s0] sm:$0xff]  ;;  %vm42_vm1 = vcmask 261120   ;;  %v123_v10 = vld [vmem:[%s740_s3 + $0x8] sm:$0xff]  ;;  %vm137_vm2 = vcmask 523264  }
   0x4   :  { %448 = vmatpush3.bf16.msra.mxu1 %v447_v4  ;;  %v122_v9 = vld [vmem:[%s740_s3] sm:$0xff]  ;;  %v124_v12 = vld [vmem:[%s740_s3 + $0x10] sm:$0xff]  ;;  %v125_v13 = vld [vmem:[%s740_s3 + $0x18] sm:$0xff]  ;;  %s553_s15 = smov [#allocation2]   ;;  %vm310_vm3 = vcmask 130048  }
   0x5   :  { %449 = vmatprep.subr.bf16.mxu1 %v550_v3  ;;  %v453_v11 = vpack.c.bf16 %v123_v10, %v122_v9  ;;  %v456_v14 = vpack.c.bf16 %v125_v13, %v124_v12  ;;  %v126_v15 = vld [vmem:[%s740_s3 + $0x20] sm:$0xff]  ;;  %v127_v16 = vld [vmem:[%s740_s3 + $0x28] sm:$0xff]  ;;  %v128_v18 = vld [vmem:[%s740_s3 + $0x30] sm:$0xff]  ;;  %s323_s16 = sshll.u32 %s553_s15, 4  ;;  %s324_s16 = int_to_ptr.vmem [resolvable:$true] %s323_s16 }
   0x6   :  { %v459_v17 = vpack.c.bf16 %v127_v16, %v126_v15  ;;  %v129_v19 = vld [vmem:[%s740_s3 + $0x38] sm:$0xff]  ;;  %v345_v21 = vld [vmem:[%s739_s2] ss:$0 sm:$0xff]  ;;  %v218_v32 = vld [vmem:[%s742_s5 + $0x8] sm:$0xff]  ;;  %s502_s17 = scalar_lea.vmem %s324_s16, 128  ;;  %p507_p1 = scmp.lt.s32.totalorder %s324_s16, %s324_s16 }
   0x7   :  { %v462_v20 = vpack.c.bf16 %v129_v19, %v128_v18  ;;  %v217_v31 = vld [vmem:[%s742_s5] sm:$0xff]  ;;  %v219_v34 = vld [vmem:[%s742_s5 + $0x10] sm:$0xff]  ;;  %v220_v35 = vld [vmem:[%s742_s5 + $0x18] sm:$0xff]  ;;  %p503_p0 = scmp.ne.s32.totalorder %s324_s16, %s502_s17  ;;  %p508_p2 = scmp.lt.s32.totalorder %s502_s17, %s502_s17 }
   0x8   :  { %451 = vmatpush3.bf16.msra.mxu1 %v450_v7  ;;  %v465_v33 = vpack.c.bf16 %v218_v32, %v217_v31  ;;  %v468_v36 = vpack.c.bf16 %v220_v35, %v219_v34  ;;  %v221_v37 = vld [vmem:[%s742_s5 + $0x20] sm:$0xff]  ;;  %v222_v38 = vld [vmem:[%s742_s5 + $0x28] sm:$0xff]  ;;  %v223_v40 = vld [vmem:[%s742_s5 + $0x30] sm:$0xff] }
   0x9   :  { %452 = vmatprep.subr.bf16.mxu1 %v550_v3  ;;  %v471_v39 = vpack.c.bf16 %v222_v38, %v221_v37  ;;  %v224_v41 = vld [vmem:[%s742_s5 + $0x38] sm:$0xff]  ;;  %v225_v43 = vld [vmem:[%s742_s5 + $0x40] sm:$0xff]  ;;  %v226_v44 = vld [vmem:[%s742_s5 + $0x48] sm:$0xff]  ;;  %p509_p3 = por %p508_p2, %p507_p1 }
   0xa   :  { %466 = vmatpush3.bf16.msra.mxu0 %v465_v33  ;;  %v474_v42 = vpack.c.bf16 %v224_v41, %v223_v40  ;;  %v477_v45 = vpack.c.bf16 %v226_v44, %v225_v43  ;;  %v227_v46 = vld [vmem:[%s742_s5 + $0x50] sm:$0xff]  ;;  %v228_v47 = vld [vmem:[%s742_s5 + $0x58] sm:$0xff]  ;;  %v229_v49 = vld [vmem:[%s742_s5 + $0x60] sm:$0xff] }
   0xb   :  { %390 = vmatmul.mubr.msk.f32.vlgmr.msra.gmra.mrb[0].mxu1 %vm42_vm1, %v30_v8  ;;  %467 = vmatprep.subr.bf16.mxu0 %v550_v3  ;;  %v480_v48 = vpack.c.bf16 %v228_v47, %v227_v46  ;;  %v230_v50 = vld [vmem:[%s742_s5 + $0x68] sm:$0xff]  ;;  %v231_v52 = vld [vmem:[%s742_s5 + $0x70] sm:$0xff]  ;;  %v232_v53 = vld [vmem:[%s742_s5 + $0x78] sm:$0xff]  ;;  %p510_p4 = pnand %p509_p3, %p503_p0 }
   0xc   :  { %408 = vmatprep.mubr.msk.f32.mxu1 %vm551_vm0, %v552_v6  ;;  %454 = vmatpush3.bf16.msra.mxu1 %v453_v11  ;;  %v483_v51 = vpack.c.bf16 %v230_v50, %v229_v49  ;;  %v486_v54 = vpack.c.bf16 %v232_v53, %v231_v52  ;;  %v347_v55 = vld [vmem:[%s741_s4] ss:$0 sm:$0xff]  ;;  %s554_s4 = smov 112  }
   0xd   :  { %455 = vmatprep.subr.bf16.mxu1 %v550_v3  ;;  %v349_v1 = vld [vmem:[%s743_s6] ss:$0 sm:$0xff] }
   0xe   :  { %469 = vmatpush3.bf16.msra.mxu0 %v468_v36 }
   0xf   :  { %470 = vmatprep.subr.bf16.mxu0 %v550_v3 }
  0x10   :  { %457 = vmatpush3.bf16.msra.mxu1 %v456_v14 }
  0x11   :  { %458 = vmatprep.subr.bf16.mxu1 %v550_v3 }
  0x12   :  { %472 = vmatpush3.bf16.msra.mxu0 %v471_v39 }
  0x13   :  { %473 = vmatprep.subr.bf16.mxu0 %v550_v3 }
  0x14   :  { %460 = vmatpush3.bf16.msra.mxu1 %v459_v17 }
  0x15   :  { %461 = vmatprep.subr.bf16.mxu1 %v550_v3 }
  0x16   :  { %475 = vmatpush3.bf16.msra.mxu0 %v474_v42 }
  0x17   :  { %476 = vmatprep.subr.bf16.mxu0 %v550_v3 }
  0x18   :  { %463 = vmatpush3.bf16.msra.mxu1 %v462_v20 }
  0x1a   :  { %478 = vmatpush3.bf16.msra.mxu0 %v477_v45 }
  0x1b   :  { %479 = vmatprep.subr.bf16.mxu0 %v550_v3 }
  0x1e   :  { %481 = vmatpush3.bf16.msra.mxu0 %v480_v48 }
  0x1f   :  { %482 = vmatprep.subr.bf16.mxu0 %v550_v3 }
  0x22   :  { %484 = vmatpush3.bf16.msra.mxu0 %v483_v51 }
  0x23   :  { %485 = vmatprep.subr.bf16.mxu0 %v550_v3 }
  0x26   :  { %487 = vmatpush3.bf16.msra.mxu0 %v486_v54 }
  0xde   :  { %v112_v22 = vpop.f32.mrb[0].mxu1 }
  0xdf   :  { %v113_v23 = vadd.f32 %v345_v21, %v112_v22  ;;  %v391_v24 = vpop.f32.mrb[1].mxu1 }
  0xe1   :  { %v116_v25 = vsub.f32 0.0, %v113_v23 }
  0xe3   :  { %v117_v26 = vmul.f32 1.442695, %v116_v25 }
  0xe5   :  { %494 = vpow2.f32 %v117_v26 }
  0xef   :  { %v495_v27 = vpop.eup %494 }
  0xf0   :  { %v119_v28 = vadd.f32 1.0, %v495_v27 }
  0xf2   :  { %496 = vrcp.f32 %v119_v28 }
  0xfc   :  { %v497_v29 = vpop.eup %496 }
  0xfd   :  { %v121_v30 = vmul.f32 %v497_v29, %v113_v23 }
  0xff   :  { %409 = vmatmul.mubr.msk.f32.vlgmr.msra.gmra.mrb[2].mxu1 %vm137_vm2, %v121_v30 }
 0x1d2   :  { %v207_v56 = vpop.f32.mrb[2].mxu1 }
 0x1d3   :  { %v208_v57 = vadd.f32 %v347_v55, %v207_v56  ;;  %v410_v58 = vpop.f32.mrb[3].mxu1 }
 0x1d5   :  { %v211_v59 = vsub.f32 0.0, %v208_v57 }
 0x1d7   :  { %v212_v60 = vmul.f32 1.442695, %v211_v59 }
 0x1d9   :  { %498 = vpow2.f32 %v212_v60 }
 0x1e3   :  { %v499_v61 = vpop.eup %498 }
 0x1e4   :  { %v214_v62 = vadd.f32 1.0, %v499_v61 }
 0x1e6   :  { %500 = vrcp.f32 %v214_v62 }
 0x1f0   :  { %v501_v63 = vpop.eup %500 }
 0x1f1   :  { %v216_v0 = vmul.f32 %v501_v63, %v208_v57 }
 0x1f3   :  { %444 = vmatmul.mubr.f32.vlgmr.msra.gmra.mrb[0].mxu0 %v216_v0 }
 0x2c6   :  { %v306_v2 = vpop.f32.mrb[0].mxu0 }
 0x2c7   :  { %v307_v3 = vadd.f32 %v349_v1, %v306_v2  ;;  %v445_v4 = vpop.f32.mrb[1].mxu0 }
 0x2c9   :  { %313 = vrot.lane.b32.xlu0 %v307_v3, %s554_s4  ;;  %311 = vst.msk [vmem:[#allocation2] sm:$0xff] %vm310_vm3, %v307_v3 }
 0x2ca   :  { %513 = shalt.err (!%p510_p4)
}
 0x2cb   :  { %s514_s19 = scalar_lea.hbm %s744_s7, 128 }
 0x2cc   :  { %p515_p5 = scmp.ne.s32.totalorder %s744_s7, %s514_s19  ;;  %p518_p6 = scmp.lt.u32.totalorder %s514_s19, %s744_s7 }
 0x2ce   :  { %p520_p7 = pnand %p518_p6, %p515_p5 }
 0x2d0   :  { %523 = shalt.err (!%p520_p7)
}
 0x2d1   :  { %326 = dma.vmem_to_hbm [thread:$0]  %s324_s16, 128, %s744_s7, [#allocation3]  }
 0x2d2   :  { %s555_s25 = smov [#allocation4]  }
 0x2d3   :  { %s333_s26 = sshll.u32 %s555_s25, 4  ;;  %s334_s26 = int_to_ptr.vmem [resolvable:$true] %s333_s26 }
 0x2d4   :  { %s524_s27 = scalar_lea.vmem %s334_s26, 128  ;;  %p529_p9 = scmp.lt.s32.totalorder %s334_s26, %s334_s26 }
 0x2d5   :  { %p525_p8 = scmp.ne.s32.totalorder %s334_s26, %s524_s27  ;;  %p530_p10 = scmp.lt.s32.totalorder %s524_s27, %s524_s27 }
 0x2d7   :  { %p531_p11 = por %p530_p10, %p529_p9 }
 0x2d9   :  { %p532_p12 = pnand %p531_p11, %p525_p8 }
 0x33b   :  { %v314_v5 = vpop.permute.xlu0 %313 }
 0x33c   :  { %316 = vst.msk [vmem:[#allocation4] sm:$0xff] %vm310_vm3, %v314_v5 }
 0x33d   :  { %535 = shalt.err (!%p532_p12)
}
 0x33e   :  { %s536_s30 = scalar_lea.hbm %s745_s8, 128 }
 0x33f   :  { %p537_p13 = scmp.ne.s32.totalorder %s745_s8, %s536_s30  ;;  %p540_p0 = scmp.lt.u32.totalorder %s536_s30, %s745_s8 }
 0x341   :  { %p542_p1 = pnand %p540_p0, %p537_p13 }
 0x343   :  { %545 = shalt.err (!%p542_p1)
}
 0x344   :  { %336 = dma.vmem_to_hbm [thread:$0]  %s334_s26, 128, %s745_s8, [#allocation5]  }
 0x345   :  { %546 = dma.done.wait [#allocation3], 128  }
 0x346   :  { %547 = vsyncadd [#allocation3], 4294967168 }
 0x347   :  { %548 = dma.done.wait [#allocation5], 128  }
 0x348   :  { %549 = vsyncadd [#allocation5], 4294967168 }
 0x349   :  { %343 = vsyncpa [#allocation3], 1 }
 0x34a   :  { %344 = vsyncpa [#allocation5], 1 }

</bundles_post_ra>
